<compile_context>
chip_gen: v7x
topology: tpu7x:2x2x1
jax: 0.10.0
libtpu: 0.0.40
codegen_flags: <defaults>
</compile_context>

<pallas_src>
import jax
import jax.numpy as jnp
from jax.experimental import pallas as pl
from jax.experimental.pallas import tpu as pltpu

_LANE = 128


def _round_up(x, m):
    return (x + m - 1) // m * m


def _choose_spatial_tile(hw, c):
    """Lane-multiple spatial tile keeping (mask + target) f32 blocks well under VMEM."""
    budget_bytes = 2 * 1024 * 1024                       # per-buffer block budget
    max_tile = max(_LANE, (budget_bytes // (4 * (c + 2))) // _LANE * _LANE)
    hw128 = _round_up(hw, _LANE)
    if hw128 <= max_tile:
        return hw128, hw128                              # one spatial step
    return max_tile, _round_up(hw, max_tile)


def _levelset_kernel(mask_ref, tgt_ref, loss_ref,
                     a_ref, b_ref, q_ref, r_ref, sf_ref, sb_ref):
    # mask_ref: (1, 2, T) block, tgt_ref: (1, C, T) block, loss_ref: (1, 1, 128) block.
    # Scratch: per-channel f32 accumulators (C, 1) + scalar (1, 1) mask sums.
    t_idx = pl.program_id(1)
    n_t = pl.num_programs(1)

    @pl.when(t_idx == 0)
    def _():
        a_ref[...] = jnp.zeros_like(a_ref)
        b_ref[...] = jnp.zeros_like(b_ref)
        q_ref[...] = jnp.zeros_like(q_ref)
        r_ref[...] = jnp.zeros_like(r_ref)
        sf_ref[...] = jnp.zeros_like(sf_ref)
        sb_ref[...] = jnp.zeros_like(sb_ref)

    sf = mask_ref[0, 0:1, :].astype(jnp.float32)         # (1, T) foreground score
    sb = mask_ref[0, 1:2, :].astype(jnp.float32)         # (1, T) background score
    t = tgt_ref[0].astype(jnp.float32)                   # (C, T) levelset target

    tsf = t * sf                                         # (C, T)
    tsb = t * sb                                         # (C, T)

    a_ref[...] += jnp.sum(tsf, axis=1, keepdims=True)    # (C, 1)  sum t*sf
    b_ref[...] += jnp.sum(tsb, axis=1, keepdims=True)    # (C, 1)  sum t*sb
    q_ref[...] += jnp.sum(t * tsf, axis=1, keepdims=True)  # (C, 1)  sum t^2*sf
    r_ref[...] += jnp.sum(t * tsb, axis=1, keepdims=True)  # (C, 1)  sum t^2*sb
    sf_ref[...] += jnp.sum(sf, axis=1, keepdims=True)    # (1, 1)  sum sf
    sb_ref[...] += jnp.sum(sb, axis=1, keepdims=True)    # (1, 1)  sum sb

    @pl.when(t_idx == n_t - 1)
    def _():
        inv_sf = 1.0 / jnp.maximum(sf_ref[...], 1e-5)    # (1, 1)
        inv_sb = 1.0 / jnp.maximum(sb_ref[...], 1e-5)
        a = a_ref[...]
        b = b_ref[...]
        # energy_c = Q - A^2/S_f + R - B^2/S_b, summed over channels, divided by C.
        energy = jnp.sum(q_ref[...] - a * a * inv_sf + r_ref[...] - b * b * inv_sb)
        inv_c = 1.0 / tgt_ref.shape[1]                   # static python constant
        loss_ref[...] = jnp.full(loss_ref.shape, energy * inv_c, dtype=loss_ref.dtype)


def levelset_loss(mask_logits, targets, pixel_num,
                  loss_weight=1.0, loss_weight_energy=1.0):
    """Equivalent of LevelsetLoss(...)(mask_logits, targets, pixel_num). Returns a scalar."""
    N, two, H, W = mask_logits.shape
    _, C, _, _ = targets.shape
    assert two == 2
    HW = H * W

    # Lane-dense flatten (free for contiguous NCHW) + zero-pad the spatial axis.
    mask_flat = mask_logits.reshape(N, 2, HW)
    tgt_flat = targets.reshape(N, C, HW)
    tile, hw_p = _choose_spatial_tile(HW, C)
    if hw_p != HW:
        pad = hw_p - HW
        # zeros contribute nothing to any accumulator (sf = sb = t = 0).
        mask_flat = jnp.pad(mask_flat, ((0, 0), (0, 0), (0, pad)))
        tgt_flat = jnp.pad(tgt_flat, ((0, 0), (0, 0), (0, pad)))
    n_t = hw_p // tile

    out = pl.pallas_call(
        _levelset_kernel,
        out_shape=jax.ShapeDtypeStruct((N, 1, _LANE), jnp.float32),
        grid_spec=pltpu.PrefetchScalarGridSpec(
            num_scalar_prefetch=0,
            grid=(N, n_t),
            in_specs=[
                pl.BlockSpec((1, 2, tile), lambda n, t: (n, 0, t)),
                pl.BlockSpec((1, C, tile), lambda n, t: (n, 0, t)),
            ],
            out_specs=pl.BlockSpec((1, 1, _LANE), lambda n, t: (n, 0, 0)),
            scratch_shapes=[
                pltpu.VMEM((C, 1), jnp.float32),   # A_c
                pltpu.VMEM((C, 1), jnp.float32),   # B_c
                pltpu.VMEM((C, 1), jnp.float32),   # Q_c
                pltpu.VMEM((C, 1), jnp.float32),   # R_c
                pltpu.VMEM((1, 1), jnp.float32),   # S_f
                pltpu.VMEM((1, 1), jnp.float32),   # S_b
            ],
        ),
        compiler_params=pltpu.CompilerParams(
            dimension_semantics=("parallel", "arbitrary")),
    )(mask_flat, tgt_flat)

    level_set = out[:, 0, 0]                              # (N,) per-sample level-set loss
    region_levelset_loss = level_set / pixel_num
    loss_energy = 0.0  # interior is None -> temporal energy term is 0
    return loss_weight * jnp.mean(region_levelset_loss) + loss_weight_energy * loss_energy


def _reference(mask_logits, targets, pixel_num):
    """Pure-JAX reference mirroring the PyTorch forward (interior=None path)."""
    mf = mask_logits[:, 0:1].astype(jnp.float32)
    mb = mask_logits[:, 1:2].astype(jnp.float32)
    t = targets.astype(jnp.float32)
    C = t.shape[1]
    interior = jnp.sum(mf * t, axis=(2, 3)) / jnp.clip(jnp.sum(mf, axis=(2, 3)), 1e-5)
    exterior = jnp.sum(mb * t, axis=(2, 3)) / jnp.clip(jnp.sum(mb, axis=(2, 3)), 1e-5)
    ei = (t - interior[:, :, None, None]) ** 2 * mf
    ee = (t - exterior[:, :, None, None]) ** 2 * mb
    level_set = jnp.sum(ei + ee, axis=(1, 2, 3)) / C
    return jnp.mean(level_set / pixel_num)


if __name__ == "__main__":
    key = jax.random.PRNGKey(0)
    k1, k2 = jax.random.split(key)

    N, C, H, W = 2, 4, 16, 16
    # mask scores in [0, 1] (sigmoid-like), targets arbitrary real values
    mask_logits = jax.random.uniform(k1, (N, 2, H, W), dtype=jnp.float32)
    targets = jax.random.normal(k2, (N, C, H, W), dtype=jnp.float32)
    pixel_num = jnp.float32(H * W)

    out = levelset_loss(mask_logits, targets, pixel_num)
    out = jax.block_until_ready(out)

    ref = _reference(mask_logits, targets, pixel_num)
    # single-pass (Q - A^2/S) form differs from the two-pass reference only by f32 rounding
    assert jnp.allclose(out, ref, rtol=1e-4, atol=1e-5), (out, ref)

    print("KERNEL_OK")
</pallas_src>

<mosaic_0001>
module attributes {stable_mosaic.version = 11 : i64} {
  func.func @_levelset_kernel(%arg0: i32, %arg1: i32, %arg2: memref<1x2x256xf32, #tpu.memory_space<vmem>>, %arg3: memref<1x4x256xf32, #tpu.memory_space<vmem>>, %arg4: memref<1x1x128xf32, #tpu.memory_space<vmem>>, %arg5: memref<4x1xf32, #tpu.memory_space<vmem>>, %arg6: memref<4x1xf32, #tpu.memory_space<vmem>>, %arg7: memref<4x1xf32, #tpu.memory_space<vmem>>, %arg8: memref<4x1xf32, #tpu.memory_space<vmem>>, %arg9: memref<1x1xf32, #tpu.memory_space<vmem>>, %arg10: memref<1x1xf32, #tpu.memory_space<vmem>>) attributes {dimension_semantics = [#tpu.dimension_semantics<parallel>, #tpu.dimension_semantics<arbitrary>], iteration_bounds = array<i64: 2, 1>, scalar_prefetch = 0 : i64, scratch_operands = 6 : i64, tpu.core_type = #tpu.core_type<tc>, window_params = [{transform_indices = @transform_0, window_bounds = array<i64: 1, 2, 256>}, {transform_indices = @transform_1, window_bounds = array<i64: 1, 4, 256>}, {transform_indices = @transform_2, window_bounds = array<i64: 1, 1, 128>}]} {
    %c0_i32 = arith.constant 0 : i32
    %0 = arith.cmpi eq, %arg1, %c0_i32 : i32
    %1 = arith.extui %0 : i1 to i32
    %c0_i32_0 = arith.constant 0 : i32
    %2 = arith.cmpi ne, %1, %c0_i32_0 : i32
    scf.if %2 {
      %cst_39 = arith.constant 0.000000e+00 : f32
      %48 = vector.broadcast %cst_39 : f32 to vector<4x1xf32>
      %c0_40 = arith.constant 0 : index
      %c0_41 = arith.constant 0 : index
      %49 = vector.load %arg5[%c0_40, %c0_41] : memref<4x1xf32, #tpu.memory_space<vmem>>, vector<4x1xf32>
      tpu.vector_store %arg5[%c0_40, %c0_41], %48 {strides = array<i32>} : memref<4x1xf32, #tpu.memory_space<vmem>>, vector<4x1xf32>,
      %cst_42 = arith.constant 0.000000e+00 : f32
      %50 = vector.broadcast %cst_42 : f32 to vector<4x1xf32>
      %c0_43 = arith.constant 0 : index
      %c0_44 = arith.constant 0 : index
      %51 = vector.load %arg6[%c0_43, %c0_44] : memref<4x1xf32, #tpu.memory_space<vmem>>, vector<4x1xf32>
      tpu.vector_store %arg6[%c0_43, %c0_44], %50 {strides = array<i32>} : memref<4x1xf32, #tpu.memory_space<vmem>>, vector<4x1xf32>,
      %cst_45 = arith.constant 0.000000e+00 : f32
      %52 = vector.broadcast %cst_45 : f32 to vector<4x1xf32>
      %c0_46 = arith.constant 0 : index
      %c0_47 = arith.constant 0 : index
      %53 = vector.load %arg7[%c0_46, %c0_47] : memref<4x1xf32, #tpu.memory_space<vmem>>, vector<4x1xf32>
      tpu.vector_store %arg7[%c0_46, %c0_47], %52 {strides = array<i32>} : memref<4x1xf32, #tpu.memory_space<vmem>>, vector<4x1xf32>,
      %cst_48 = arith.constant 0.000000e+00 : f32
      %54 = vector.broadcast %cst_48 : f32 to vector<4x1xf32>
      %c0_49 = arith.constant 0 : index
      %c0_50 = arith.constant 0 : index
      %55 = vector.load %arg8[%c0_49, %c0_50] : memref<4x1xf32, #tpu.memory_space<vmem>>, vector<4x1xf32>
      tpu.vector_store %arg8[%c0_49, %c0_50], %54 {strides = array<i32>} : memref<4x1xf32, #tpu.memory_space<vmem>>, vector<4x1xf32>,
      %cst_51 = arith.constant 0.000000e+00 : f32
      %56 = vector.broadcast %cst_51 : f32 to vector<1x1xf32>
      %c0_52 = arith.constant 0 : index
      %c0_53 = arith.constant 0 : index
      %57 = vector.load %arg9[%c0_52, %c0_53] : memref<1x1xf32, #tpu.memory_space<vmem>>, vector<1x1xf32>
      tpu.vector_store %arg9[%c0_52, %c0_53], %56 {strides = array<i32>} : memref<1x1xf32, #tpu.memory_space<vmem>>, vector<1x1xf32>,
      %cst_54 = arith.constant 0.000000e+00 : f32
      %58 = vector.broadcast %cst_54 : f32 to vector<1x1xf32>
      %c0_55 = arith.constant 0 : index
      %c0_56 = arith.constant 0 : index
      %59 = vector.load %arg10[%c0_55, %c0_56] : memref<1x1xf32, #tpu.memory_space<vmem>>, vector<1x1xf32>
      tpu.vector_store %arg10[%c0_55, %c0_56], %58 {strides = array<i32>} : memref<1x1xf32, #tpu.memory_space<vmem>>, vector<1x1xf32>,
    } else {
    }
    %c0 = arith.constant 0 : index
    %c0_1 = arith.constant 0 : index
    %c0_2 = arith.constant 0 : index
    %3 = vector.load %arg2[%c0, %c0_1, %c0_2] : memref<1x2x256xf32, #tpu.memory_space<vmem>>, vector<1x1x256xf32>
    %4 = vector.shape_cast %3 : vector<1x1x256xf32> to vector<1x256xf32>
    %c0_3 = arith.constant 0 : index
    %c1 = arith.constant 1 : index
    %c0_4 = arith.constant 0 : index
    %5 = vector.load %arg2[%c0_3, %c1, %c0_4] : memref<1x2x256xf32, #tpu.memory_space<vmem>>, vector<1x1x256xf32>
    %6 = vector.shape_cast %5 : vector<1x1x256xf32> to vector<1x256xf32>
    %c0_5 = arith.constant 0 : index
    %c0_6 = arith.constant 0 : index
    %c0_7 = arith.constant 0 : index
    %7 = vector.load %arg3[%c0_5, %c0_6, %c0_7] : memref<1x4x256xf32, #tpu.memory_space<vmem>>, vector<1x4x256xf32>
    %8 = vector.shape_cast %7 : vector<1x4x256xf32> to vector<4x256xf32>
    %9 = vector.broadcast %4 : vector<1x256xf32> to vector<4x256xf32>
    %10 = arith.mulf %8, %9 : vector<4x256xf32>
    %11 = vector.broadcast %6 : vector<1x256xf32> to vector<4x256xf32>
    %12 = arith.mulf %8, %11 : vector<4x256xf32>
    %c0_8 = arith.constant 0 : index
    %c0_9 = arith.constant 0 : index
    %13 = vector.load %arg5[%c0_8, %c0_9] : memref<4x1xf32, #tpu.memory_space<vmem>>, vector<4x1xf32>
    %cst = arith.constant dense<0.000000e+00> : vector<4xf32>
    %14 = vector.multi_reduction <add>, %10, %cst [1] : vector<4x256xf32> to vector<4xf32>
    %15 = vector.shape_cast %14 : vector<4xf32> to vector<4x1xf32>
    %16 = arith.addf %13, %15 : vector<4x1xf32>
    %c0_10 = arith.constant 0 : index
    %c0_11 = arith.constant 0 : index
    %17 = vector.load %arg5[%c0_10, %c0_11] : memref<4x1xf32, #tpu.memory_space<vmem>>, vector<4x1xf32>
    tpu.vector_store %arg5[%c0_10, %c0_11], %16 {strides = array<i32>} : memref<4x1xf32, #tpu.memory_space<vmem>>, vector<4x1xf32>,
    %c0_12 = arith.constant 0 : index
    %c0_13 = arith.constant 0 : index
    %18 = vector.load %arg6[%c0_12, %c0_13] : memref<4x1xf32, #tpu.memory_space<vmem>>, vector<4x1xf32>
    %cst_14 = arith.constant dense<0.000000e+00> : vector<4xf32>
    %19 = vector.multi_reduction <add>, %12, %cst_14 [1] : vector<4x256xf32> to vector<4xf32>
    %20 = vector.shape_cast %19 : vector<4xf32> to vector<4x1xf32>
    %21 = arith.addf %18, %20 : vector<4x1xf32>
    %c0_15 = arith.constant 0 : index
    %c0_16 = arith.constant 0 : index
    %22 = vector.load %arg6[%c0_15, %c0_16] : memref<4x1xf32, #tpu.memory_space<vmem>>, vector<4x1xf32>
    tpu.vector_store %arg6[%c0_15, %c0_16], %21 {strides = array<i32>} : memref<4x1xf32, #tpu.memory_space<vmem>>, vector<4x1xf32>,
    %c0_17 = arith.constant 0 : index
    %c0_18 = arith.constant 0 : index
    %23 = vector.load %arg7[%c0_17, %c0_18] : memref<4x1xf32, #tpu.memory_space<vmem>>, vector<4x1xf32>
    %24 = arith.mulf %8, %10 : vector<4x256xf32>
    %cst_19 = arith.constant dense<0.000000e+00> : vector<4xf32>
    %25 = vector.multi_reduction <add>, %24, %cst_19 [1] : vector<4x256xf32> to vector<4xf32>
    %26 = vector.shape_cast %25 : vector<4xf32> to vector<4x1xf32>
    %27 = arith.addf %23, %26 : vector<4x1xf32>
    %c0_20 = arith.constant 0 : index
    %c0_21 = arith.constant 0 : index
    %28 = vector.load %arg7[%c0_20, %c0_21] : memref<4x1xf32, #tpu.memory_space<vmem>>, vector<4x1xf32>
    tpu.vector_store %arg7[%c0_20, %c0_21], %27 {strides = array<i32>} : memref<4x1xf32, #tpu.memory_space<vmem>>, vector<4x1xf32>,
    %c0_22 = arith.constant 0 : index
    %c0_23 = arith.constant 0 : index
    %29 = vector.load %arg8[%c0_22, %c0_23] : memref<4x1xf32, #tpu.memory_space<vmem>>, vector<4x1xf32>
    %30 = arith.mulf %8, %12 : vector<4x256xf32>
    %cst_24 = arith.constant dense<0.000000e+00> : vector<4xf32>
    %31 = vector.multi_reduction <add>, %30, %cst_24 [1] : vector<4x256xf32> to vector<4xf32>
    %32 = vector.shape_cast %31 : vector<4xf32> to vector<4x1xf32>
    %33 = arith.addf %29, %32 : vector<4x1xf32>
    %c0_25 = arith.constant 0 : index
    %c0_26 = arith.constant 0 : index
    %34 = vector.load %arg8[%c0_25, %c0_26] : memref<4x1xf32, #tpu.memory_space<vmem>>, vector<4x1xf32>
    tpu.vector_store %arg8[%c0_25, %c0_26], %33 {strides = array<i32>} : memref<4x1xf32, #tpu.memory_space<vmem>>, vector<4x1xf32>,
    %c0_27 = arith.constant 0 : index
    %c0_28 = arith.constant 0 : index
    %35 = vector.load %arg9[%c0_27, %c0_28] : memref<1x1xf32, #tpu.memory_space<vmem>>, vector<1x1xf32>
    %cst_29 = arith.constant dense<0.000000e+00> : vector<1xf32>
    %36 = vector.multi_reduction <add>, %4, %cst_29 [1] : vector<1x256xf32> to vector<1xf32>
    %37 = vector.shape_cast %36 : vector<1xf32> to vector<1x1xf32>
    %38 = arith.addf %35, %37 : vector<1x1xf32>
    %c0_30 = arith.constant 0 : index
    %c0_31 = arith.constant 0 : index
    %39 = vector.load %arg9[%c0_30, %c0_31] : memref<1x1xf32, #tpu.memory_space<vmem>>, vector<1x1xf32>
    tpu.vector_store %arg9[%c0_30, %c0_31], %38 {strides = array<i32>} : memref<1x1xf32, #tpu.memory_space<vmem>>, vector<1x1xf32>,
    %c0_32 = arith.constant 0 : index
    %c0_33 = arith.constant 0 : index
    %40 = vector.load %arg10[%c0_32, %c0_33] : memref<1x1xf32, #tpu.memory_space<vmem>>, vector<1x1xf32>
    %cst_34 = arith.constant dense<0.000000e+00> : vector<1xf32>
    %41 = vector.multi_reduction <add>, %6, %cst_34 [1] : vector<1x256xf32> to vector<1xf32>
    %42 = vector.shape_cast %41 : vector<1xf32> to vector<1x1xf32>
    %43 = arith.addf %40, %42 : vector<1x1xf32>
    %c0_35 = arith.constant 0 : index
    %c0_36 = arith.constant 0 : index
    %44 = vector.load %arg10[%c0_35, %c0_36] : memref<1x1xf32, #tpu.memory_space<vmem>>, vector<1x1xf32>
    tpu.vector_store %arg10[%c0_35, %c0_36], %43 {strides = array<i32>} : memref<1x1xf32, #tpu.memory_space<vmem>>, vector<1x1xf32>,
    %c0_i32_37 = arith.constant 0 : i32
    %45 = arith.cmpi eq, %arg1, %c0_i32_37 : i32
    %46 = arith.extui %45 : i1 to i32
    %c0_i32_38 = arith.constant 0 : i32
    %47 = arith.cmpi ne, %46, %c0_i32_38 : i32
    scf.if %47 {
      %c0_39 = arith.constant 0 : index
      %c0_40 = arith.constant 0 : index
      %48 = vector.load %arg9[%c0_39, %c0_40] : memref<1x1xf32, #tpu.memory_space<vmem>>, vector<1x1xf32>
      %cst_41 = arith.constant 9.99999974E-6 : f32
      %49 = vector.broadcast %cst_41 : f32 to vector<1x1xf32>
      %50 = arith.maximumf %48, %49 : vector<1x1xf32>
      %cst_42 = arith.constant 1.000000e+00 : f32
      %51 = vector.broadcast %cst_42 : f32 to vector<1x1xf32>
      %52 = arith.divf %51, %50 : vector<1x1xf32>
      %c0_43 = arith.constant 0 : index
      %c0_44 = arith.constant 0 : index
      %53 = vector.load %arg10[%c0_43, %c0_44] : memref<1x1xf32, #tpu.memory_space<vmem>>, vector<1x1xf32>
      %cst_45 = arith.constant 9.99999974E-6 : f32
      %54 = vector.broadcast %cst_45 : f32 to vector<1x1xf32>
      %55 = arith.maximumf %53, %54 : vector<1x1xf32>
      %cst_46 = arith.constant 1.000000e+00 : f32
      %56 = vector.broadcast %cst_46 : f32 to vector<1x1xf32>
      %57 = arith.divf %56, %55 : vector<1x1xf32>
      %c0_47 = arith.constant 0 : index
      %c0_48 = arith.constant 0 : index
      %58 = vector.load %arg5[%c0_47, %c0_48] : memref<4x1xf32, #tpu.memory_space<vmem>>, vector<4x1xf32>
      %c0_49 = arith.constant 0 : index
      %c0_50 = arith.constant 0 : index
      %59 = vector.load %arg6[%c0_49, %c0_50] : memref<4x1xf32, #tpu.memory_space<vmem>>, vector<4x1xf32>
      %c0_51 = arith.constant 0 : index
      %c0_52 = arith.constant 0 : index
      %60 = vector.load %arg7[%c0_51, %c0_52] : memref<4x1xf32, #tpu.memory_space<vmem>>, vector<4x1xf32>
      %61 = arith.mulf %58, %58 : vector<4x1xf32>
      %62 = vector.broadcast %52 : vector<1x1xf32> to vector<4x1xf32>
      %63 = arith.mulf %61, %62 : vector<4x1xf32>
      %64 = arith.subf %60, %63 : vector<4x1xf32>
      %c0_53 = arith.constant 0 : index
      %c0_54 = arith.constant 0 : index
      %65 = vector.load %arg8[%c0_53, %c0_54] : memref<4x1xf32, #tpu.memory_space<vmem>>, vector<4x1xf32>
      %66 = arith.addf %64, %65 : vector<4x1xf32>
      %67 = arith.mulf %59, %59 : vector<4x1xf32>
      %68 = vector.broadcast %57 : vector<1x1xf32> to vector<4x1xf32>
      %69 = arith.mulf %67, %68 : vector<4x1xf32>
      %70 = arith.subf %66, %69 : vector<4x1xf32>
      %71 = vector.shape_cast %70 : vector<4x1xf32> to vector<1x4x1xf32>
      %cst_55 = arith.constant dense<0.000000e+00> : vector<1xf32>
      %72 = vector.multi_reduction <add>, %71, %cst_55 [1, 2] : vector<1x4x1xf32> to vector<1xf32>
      %73 = vector.shape_cast %72 : vector<1xf32> to vector<1x1x1xf32>
      %74 = vector.extract %73[0, 0, 0] : f32 from vector<1x1x1xf32>
      %cst_56 = arith.constant 2.500000e-01 : f32
      %75 = arith.mulf %74, %cst_56 : f32
      %76 = vector.broadcast %75 : f32 to vector<1x1x128xf32>
      %c0_57 = arith.constant 0 : index
      %c0_58 = arith.constant 0 : index
      %c0_59 = arith.constant 0 : index
      %77 = vector.load %arg4[%c0_57, %c0_58, %c0_59] : memref<1x1x128xf32, #tpu.memory_space<vmem>>, vector<1x1x128xf32>
      tpu.vector_store %arg4[%c0_57, %c0_58, %c0_59], %76 {strides = array<i32>} : memref<1x1x128xf32, #tpu.memory_space<vmem>>, vector<1x1x128xf32>,
    } else {
    }
    return
  }
  func.func @transform_0(%arg0: i32, %arg1: i32) -> (i32, i32, i32) {
    %c0_i32 = arith.constant 0 : i32
    %c0_i32_0 = arith.constant 0 : i32
    return %arg0, %c0_i32, %arg1 : i32, i32, i32
  }
  func.func @transform_1(%arg0: i32, %arg1: i32) -> (i32, i32, i32) {
    %c0_i32 = arith.constant 0 : i32
    %c0_i32_0 = arith.constant 0 : i32
    return %arg0, %c0_i32, %arg1 : i32, i32, i32
  }
  func.func @transform_2(%arg0: i32, %arg1: i32) -> (i32, i32, i32) {
    %c0_i32 = arith.constant 0 : i32
    %c0_i32_0 = arith.constant 0 : i32
    %c0_i32_1 = arith.constant 0 : i32
    return %arg0, %c0_i32, %c0_i32_0 : i32, i32, i32
  }
}

</mosaic_0001>

<bundles_post_ra>
// kernel: tpu_custom_call.1
= control target key start
LH: loop header
LB: loop body
LE: loop exit
PB: predicated region body
PF: predicated region fallthrough
CT: control target
= control target key end

     0   :  { %7 = vsyncpa [#allocation9], 0  ;;  %s995_s0 = inlined_call_operand.hbm [shape: f32[2,2,256], index: 0, kind: input, shape index: {}]   ;;  %s996_s1 = inlined_call_operand.hbm [shape: f32[2,4,256], index: 1, kind: input, shape index: {}]   ;;  %s997_s2 = inlined_call_operand.hbm [shape: f32[2,1,128], index: 2, kind: output, shape index: {}]  }
   0x1   :  { %9 = vsyncpa [#allocation9 + $0x1], 0 }
   0x2   :  { %10 = vsyncpa [#allocation12], 0 }
   0x3   :  { %12 = vsyncpa [#allocation12 + $0x1], 0 }
   0x4   :  { %13 = vsyncpa [#allocation10], 0 }
   0x5   :  { %15 = vsyncpa [#allocation10 + $0x1], 0  ;;  %s752_s9 = smov 0   ;;  %s754_s10 = smov 0  }
   0x6   :  { %s756_s11 = smov 0   ;;  %s758_s12 = smov 0  }
   0x7   :  { %s760_s13 = smov 0   ;;  %s762_s14 = smov 0  }
   0x8 LB: > { %s492_s15 = sadd.s32 4294967295, %s731_s14   ;;  %s493_s16 = sadd.s32 4294967294, %s731_s14   ;;  %s731_s14 = sphi %s762_s14, %s21_s14   ;;  %s727_s13 = sphi %s760_s13, %s1017_s13   ;;  %s723_s12 = sphi %s758_s12, %s1016_s12   ;;  %s719_s11 = sphi %s756_s11, %s1015_s11   ;;  %s715_s10 = sphi %s754_s10, %s1014_s10   ;;  %s711_s9 = sphi %s752_s9, %s1013_s9  }
   0x9   : > { %s33_s17 = sadd.s32 1, %s727_s13  ;;  %s42_s18 = sadd.s32 1, %s719_s11 }
   0xa   : > { %p35_p0 = scmp.ge.s32.totalorder %s33_s17, 2  ;;  %p49_p1 = scmp.ne.s32.totalorder %s719_s11, %s715_s10 }
   0xb   : > { %p50_p2 = scmp.eq.s32.totalorder %s731_s14, 0  ;;  %p55_p3 = scmp.ne.s32.totalorder %s715_s10, %s711_s9 }
   0xc   : > { %s1019_s17 = smov (%p35_p0, %s33_s17), 0  ;;  %p56_p5 = scmp.eq.s32.totalorder %s492_s15, 0 }
   0xd   : > { %p793_p4 = por %p50_p2, %p49_p1  ;;  %s37_s20 = ssub.s32 %s727_s13, %s1019_s17 }
   0xe   : > { %p107_p6 = scmp.eq.s32.totalorder %s492_s15, 1  ;;  %p40_p7 = scmp.eq.s32.totalorder %s37_s20, 0 }
   0xf   : > { %p799_p8 = por %p56_p5, %p55_p3  ;;  %p113_p10 = scmp.eq.s32.totalorder %s493_s16, 1 }
  0x10   : > { %p803_p9 = por %p107_p6, %p49_p1  ;;  %p530_p13 = scmp.lt.s32.totalorder %s731_s14, 2 }
  0x11   : > { %s1001_s21 = scalar_select %p799_p8, 1, 0 }
  0x12   : > { %s1002_s22 = scalar_select %p803_p9, 1, 0 }
  0x13   : > { %s808_s23 = scalar_select %p40_p7, %s719_s11, %s42_s18  }
  0x14   : > { %p810_p11 = por %p113_p10, %p55_p3  ;;  %s817_s25 = sand.u32 1, %s719_s11  }
  0x15   : > { %s496_s26 = sshll.u32 %s817_s25, 2  ;;  %s509_s27 = sshll.u32 %s727_s13, 6 }
  0x16   : > { %s1003_s24 = scalar_select %p810_p11, 1, 0 }
  0x17   : > { %s824_s30 = scalar_lea.hbm %s995_s0, %s509_s27  ;;  %s137_s3 = scalar_lea.vmem [#allocation8], %s496_s26 }
  0x18   : > { %s147_s4 = sshll.u32 %s137_s3, 4  ;;  %p830_p0 = pnand %p530_p13, %p793_p4  ;;  %s826_s4 = int_to_ptr.vmem [resolvable:$true] %s147_s4 }
  0x19   : > { %s134_s6 = scalar_lea.sflag [#allocation9], %s817_s25  ;;  %s585_s7 = scalar_lea.hbm %s824_s30, 64 }
  0x1a   : > { %p586_p3 = scmp.ne.s32.totalorder %s824_s30, %s585_s7  ;;  %p587_p5 = pneg %p830_p0 }
  0x1b   : > { %s590_s16 = scalar_lea.hbm %s995_s0, 128  ;;  %p591_p4 = scmp.lt.u32.totalorder %s824_s30, %s995_s0 }
  0x1c   : > { %p588_p6 = pnand %p587_p5, %p586_p3  ;;  %p592_p10 = scmp.lt.u32.totalorder %s590_s16, %s585_s7 }
  0x1d   : > { %p594_p12 = scmp.lt.u32.totalorder %s585_s7, %s824_s30 }
  0x1e   : > { %p589_p7 = pneg %p588_p6  ;;  %p593_p13 = por %p592_p10, %p591_p4 }
  0x20   : > { %p595_p1 = por %p594_p12, %p593_p13 }
  0x22   : > { %p596_p2 = pnand %p595_p1, %p589_p7 }
  0x24   : > { %599 = shalt.err (!%p596_p2)
}
  0x25   : > { %s600_s20 = scalar_lea.vmem %s826_s4, 64  ;;  %s733_s26 = smov [#allocation8]  }
  0x26   : > { %p601_p3 = scmp.ne.s32.totalorder %s826_s4, %s600_s20  ;;  %s605_s27 = sshll.u32 %s733_s26, 4  ;;  %s606_s27 = int_to_ptr.vmem [resolvable:$false] %s605_s27 }
  0x27   : > { %s607_s28 = scalar_lea.vmem %s606_s27, 128  ;;  %p608_p9 = scmp.lt.s32.totalorder %s826_s4, %s606_s27 }
  0x28   : > { %p603_p6 = pnand %p601_p3, %p587_p5  ;;  %p609_p4 = scmp.lt.s32.totalorder %s607_s28, %s600_s20 }
  0x2a   : > { %p604_p11 = pneg %p603_p6  ;;  %p610_p10 = por %p609_p4, %p608_p9 }
  0x2c   : > { %p611_p12 = pnand %p610_p10, %p604_p11 }
  0x2e   : > { %614 = shalt.err (!%p611_p12)
}
  0x2f   : > { %522 = dma.hbm_to_vmem [thread:$0]  (!%p830_p0), %s824_s30, 64, %s826_s4, %s134_s6  }
  0x30   : > { %p1005_p1 = scmp.lt.s32.totalorder %s731_s14, 3  ;;  %p1006_p2 = scmp.ge.s32.totalorder %s731_s14, 1 }
  0x31   : > { %s499_s3 = sshll.u32 %s817_s25, 3  ;;  %s510_s7 = sshll.u32 %s727_s13, 7 }
  0x32   : > { %p866_p7 = pnand %p1006_p2, %p1005_p1  ;;  %s875_s16 = scalar_lea.hbm %s996_s1, %s510_s7 }
  0x33   : > { %s158_s18 = scalar_lea.vmem [#allocation11], %s499_s3  ;;  %s155_s30 = scalar_lea.sflag [#allocation12], %s817_s25 }
  0x34   : > { %s1007_s29 = scalar_select %p866_p7, 1, 0 }
  0x35   : > { %s168_s19 = sshll.u32 %s158_s18, 4  ;;  %s615_s4 = scalar_lea.hbm %s875_s16, 128  ;;  %s169_s19 = int_to_ptr.vmem [resolvable:$true] %s168_s19 }
  0x36   : > { %p616_p9 = scmp.ne.s32.totalorder %s875_s16, %s615_s4  ;;  %s620_s26 = scalar_lea.hbm %s996_s1, 256 }
  0x37   : > { %p621_p3 = scmp.lt.u32.totalorder %s875_s16, %s996_s1  ;;  %p622_p6 = scmp.lt.u32.totalorder %s620_s26, %s615_s4 }
  0x38   : > { %p618_p11 = pnand %p616_p9, %p587_p5  ;;  %p624_p10 = scmp.lt.u32.totalorder %s615_s4, %s875_s16 }
  0x39   : > { %p623_p4 = por %p622_p6, %p621_p3 }
  0x3a   : > { %p619_p13 = pneg %p618_p11 }
  0x3b   : > { %p625_p12 = por %p624_p10, %p623_p4 }
  0x3d   : > { %p626_p1 = pnand %p625_p12, %p619_p13 }
  0x3f   : > { %629 = shalt.err (!%p626_p1)
}
  0x40   : > { %s630_s25 = scalar_lea.vmem %s169_s19, 128  ;;  %s734_s3 = smov [#allocation11]  }
  0x41   : > { %p631_p2 = scmp.ne.s32.totalorder %s169_s19, %s630_s25  ;;  %s635_s7 = sshll.u32 %s734_s3, 4  ;;  %s636_s7 = int_to_ptr.vmem [resolvable:$false] %s635_s7 }
  0x42   : > { %s637_s8 = scalar_lea.vmem %s636_s7, 256  ;;  %p638_p8 = scmp.lt.s32.totalorder %s169_s19, %s636_s7 }
  0x43   : > { %p633_p9 = pnand %p631_p2, %p587_p5  ;;  %p639_p7 = scmp.lt.s32.totalorder %s637_s8, %s630_s25 }
  0x45   : > { %p634_p11 = pneg %p633_p9  ;;  %p640_p3 = por %p639_p7, %p638_p8 }
  0x47   : > { %p641_p6 = pnand %p640_p3, %p634_p11 }
  0x49   : > { %644 = shalt.err (!%p641_p6)
}
  0x4a   : > { %525 = dma.hbm_to_vmem [thread:$0]  (!%p830_p0), %s875_s16, 128, %s169_s19, %s155_s30  }
  0x4b   : > { %p1008_p13 = scmp.ne.s32.totalorder %s1007_s29, 0 }
  0x4c   : > { %s900_s15 = sand.u32 (!%p1008_p13), 1, %s715_s10   ;;  %p1009_p5 = scmp.ne.s32.totalorder (!%p1008_p13), %s1001_s21, 0 }
  0x4d   : > { %177 = sbr.rel (%p1008_p13) target bundleno = 496 (0x1f0), region = 28  ;;  %s503_s18 = sshll.u32 (!%p1008_p13), %s900_s15, 2 }
  0x4e   : > { %s180_s4 = scalar_lea.sflag (!%p1008_p13), [#allocation9], %s900_s15  ;;  %s183_s6 = scalar_lea.vmem (!%p1008_p13), [#allocation8], %s503_s18 }
  0x54   : > { %698 = dma.done.wait (%p1009_p5), %s180_s4, 64  }
  0x55   : > { %700 = vsyncadd (%p1009_p5), %s180_s4, 4294967232  ;;  %s504_s5 = sshll.u32 %s900_s15, 3  ;;  %s189_s29 = scalar_lea.sflag [#allocation12], %s900_s15 }
  0x56   : > { %s192_s16 = scalar_lea.vmem [#allocation11], %s504_s5 }
  0x57   : > { %702 = dma.done.wait (%p1009_p5), %s189_s29, 128  }
  0x58   : > { %704 = vsyncadd (%p1009_p5), %s189_s29, 4294967168  ;;  %v236_v0 = vlaneseq  ;;  %vm228_vm0 = vcmask 0   ;;  %v735_v2 = vmov 0.0   ;;  %vm310_vm1 = vcmask 1040384   ;;  %v234_v11 = vld [vmem:[%s192_s16] sm:$0xff]  ;;  %s216_s21 = scalar_lea.vmem [#allocation13], %s900_s15 }
  0x59   : > { %229 = vst.msk [vmem:[#allocation6] sm:$0x1] %vm228_vm0, %v735_v2  ;;  %230 = vst.msk [vmem:[#allocation7] sm:$0x1] %vm228_vm0, %v735_v2  ;;  %vm263_vm2 = vcmask 1043456   ;;  %vm223_vm3 = vcmask 3072  }
  0x5a   : > { %v237_v1 = vshrl.u32 %v236_v0, 7  ;;  %v231_v5 = vld [vmem:[%s183_s6] ss:$2 sm:$0x3]  ;;  %224 = vst.msk [vmem:[#allocation2] sm:$0xf] %vm223_vm3, %v735_v2 }
  0x5b   : > { %v505_v6 = vld [vmem:[%s183_s6 + $0x1] ss:$2 sm:$0x3]  ;;  %225 = vst.msk [vmem:[#allocation3] sm:$0xf] %vm223_vm3, %v735_v2  ;;  %s389_s19 = sshll.u32 %s216_s21, 4  ;;  %s948_s19 = int_to_ptr.vmem [resolvable:$true] %s389_s19 }
  0x5c   : > { %v916_v3 = vsub.s32 0, %v237_v1  ;;  %v242_v4 = vsub.s32 1, %v237_v1  ;;  %226 = vst.msk [vmem:[#allocation4] sm:$0xf] %vm223_vm3, %v735_v2  ;;  %227 = vst.msk [vmem:[#allocation5] sm:$0xf] %vm223_vm3, %v735_v2 }
  0x5d   : > { %s506_s30 = sshll.u32 %s723_s12, 4  ;;  %s377_s3 = scalar_lea.sflag [#allocation10], %s900_s15 }
  0x5e   : > { %v239_v7 = vrot.slane %v231_v5, %v916_v3  ;;  %v243_v8 = vrot.slane %v231_v5, %v242_v4  ;;  %v251_v9 = vrot.slane %v505_v6, %v916_v3  ;;  %v255_v10 = vrot.slane %v505_v6, %v242_v4  ;;  %s946_s25 = scalar_lea.hbm %s997_s2, %s506_s30  ;;  %s645_s7 = scalar_lea.vmem %s948_s19, 16 }
  0x5f   : > { %p646_p8 = scmp.ne.s32.totalorder %s948_s19, %s645_s7  ;;  %p1010_p0 = scmp.ne.s32.totalorder %s1002_s22, 0 }
  0x60   : > { %v311_v12 = vsel %vm310_vm1, %v239_v7, 0.0  ;;  %v312_v13 = vsel %vm310_vm1, %v243_v8, 0.0  ;;  %v244_v14 = vcombine.low %v239_v7, %v243_v8  ;;  %v256_v15 = vcombine.low %v251_v9, %v255_v10  ;;  %v307_v40 = vld [vmem:[#allocation6] sm:$0x1]  ;;  %v319_v43 = vld [vmem:[#allocation7] sm:$0x1] }
  0x61   : > { %v313_v16 = vadd.f32 %v312_v13, %v311_v12  ;;  %v322_v17 = vsel %vm310_vm1, %v251_v9, 0.0  ;;  %v323_v18 = vsel %vm310_vm1, %v255_v10, 0.0  ;;  %v259_v45 = vld [vmem:[#allocation2] sm:$0xf]  ;;  %p647_p7 = pnand %p646_p8, %p1010_p0  ;;  %s736_s12 = smov [#allocation13]  }
  0x62   : > { %v246_v19 = vmul.f32 %v244_v14, %v234_v11  ;;  %v258_v20 = vmul.f32 %v256_v15, %v234_v11  ;;  %v324_v21 = vadd.f32 %v323_v18, %v322_v17  ;;  %v272_v50 = vld [vmem:[#allocation3] sm:$0xf]  ;;  %s649_s8 = sshll.u32 %s736_s12, 4  ;;  %s650_s8 = int_to_ptr.vmem [resolvable:$false] %s649_s8 }
  0x63   : > { %314 = vadd.xlane.f32.xlu0 %v313_v16  ;;  %v283_v49 = vld [vmem:[#allocation4] sm:$0xf]  ;;  %v295_v57 = vld [vmem:[#allocation5] sm:$0xf]  ;;  %p648_p4 = pneg %p647_p7  ;;  %s651_s18 = scalar_lea.vmem %s650_s8, 32 }
  0x64   : > { %v261_v22 = vcombine.high %v246_v19, %v246_v19  ;;  %v264_v23 = vsel %vm263_vm2, %v246_v19, 0.0  ;;  %v274_v24 = vcombine.high %v258_v20, %v258_v20  ;;  %v284_v25 = vmul.f32 %v246_v19, %v234_v11  ;;  %p652_p10 = scmp.lt.s32.totalorder %s948_s19, %s650_s8  ;;  %p653_p12 = scmp.lt.s32.totalorder %s651_s18, %s645_s7 }
  0x65   : > { %v296_v26 = vmul.f32 %v258_v20, %v234_v11  ;;  %v276_v28 = vsel %vm263_vm2, %v258_v20, 0.0 }
  0x66   : > { %v265_v27 = vsel %vm263_vm2, %v261_v22, 0.0  ;;  %v277_v29 = vsel %vm263_vm2, %v274_v24, 0.0  ;;  %v286_v31 = vcombine.high %v284_v25, %v284_v25  ;;  %v288_v32 = vsel %vm263_vm2, %v284_v25, 0.0  ;;  %p654_p1 = por %p653_p12, %p652_p10 }
  0x67   : > { %325 = vadd.xlane.f32.xlu0 %v324_v21  ;;  %v266_v30 = vadd.f32 %v265_v27, %v264_v23  ;;  %v298_v33 = vcombine.high %v296_v26, %v296_v26  ;;  %v278_v34 = vadd.f32 %v277_v29, %v276_v28  ;;  %v300_v37 = vsel %vm263_vm2, %v296_v26, 0.0 }
  0x68   : > { %v289_v35 = vsel %vm263_vm2, %v286_v31, 0.0  ;;  %p655_p2 = pnand %p654_p1, %p648_p4 }
  0x69   : > { %267 = vadd.xlane.f32.xlu1 %v266_v30  ;;  %v290_v36 = vadd.f32 %v289_v35, %v288_v32  ;;  %v301_v38 = vsel %vm263_vm2, %v298_v33, 0.0 }
  0x6a   : > { %v302_v39 = vadd.f32 %v301_v38, %v300_v37 }
  0x6b   : > { %291 = vadd.xlane.f32.xlu0 %v290_v36 }
  0x6d   : > { %279 = vadd.xlane.f32.xlu1 %v278_v34 }
  0x71   : > { %303 = vadd.xlane.f32.xlu1 %v302_v39 }
  0xf0   : > { %v315_v41 = vpop.xlane.xlu0 %314 }
  0xf1   : > { %v316_v42 = vadd.f32 %v315_v41, %v307_v40 }
  0xf3   : > { %318 = vst.msk [vmem:[#allocation6] sm:$0x1] %vm228_vm0, %v316_v42 }
  0xf4   : > { %v326_v44 = vpop.xlane.xlu0 %325 }
  0xf5   : > { %v327_v46 = vadd.f32 %v326_v44, %v319_v43 }
  0xf6   : > { %v268_v47 = vpop.xlane.xlu1 %267 }
  0xf7   : > { %328 = vst.msk [vmem:[#allocation7] sm:$0x1] %vm228_vm0, %v327_v46  ;;  %v269_v48 = vadd.f32 %v268_v47, %v259_v45 }
  0xf8   : > { %v292_v51 = vpop.xlane.xlu0 %291 }
  0xf9   : > { %271 = vst.msk [vmem:[#allocation2] sm:$0xf] %vm223_vm3, %v269_v48  ;;  %v293_v53 = vadd.f32 %v292_v51, %v283_v49 }
  0xfa   : > { %v280_v52 = vpop.xlane.xlu1 %279  ;;  %v332_v54 = vld [vmem:[#allocation6] sm:$0x1] }
  0xfb   : > { %v281_v55 = vadd.f32 %v280_v52, %v272_v50  ;;  %v333_v56 = vmax.f32 %v332_v54, 1e-05  ;;  %294 = vst.msk [vmem:[#allocation4] sm:$0xf] %vm223_vm3, %v293_v53 }
  0xfd   : > { %282 = vst.msk [vmem:[#allocation3] sm:$0xf] %vm223_vm3, %v281_v55  ;;  %581 = vrcp.f32 %v333_v56 }
  0xfe   : > { %v304_v58 = vpop.xlane.xlu1 %303  ;;  %v336_v59 = vld [vmem:[#allocation7] sm:$0x1] }
  0xff   : > { %v305_v60 = vadd.f32 %v304_v58, %v295_v57  ;;  %v337_v61 = vmax.f32 %v336_v59, 1e-05 }
 0x100   : > { %v340_v62 = vld [vmem:[#allocation2] sm:$0xf] }
 0x101   : > { %306 = vst.msk [vmem:[#allocation5] sm:$0xf] %vm223_vm3, %v305_v60  ;;  %583 = vrcp.f32 %v337_v61  ;;  %v343_v0 = vmul.f32 %v340_v62, %v340_v62 }
 0x102   : > { %v342_v4 = vld [vmem:[#allocation4] sm:$0xf] }
 0x104   : > { %v341_v2 = vld [vmem:[#allocation3] sm:$0xf] }
 0x105   : > { %v354_v9 = vmul.f32 %v341_v2, %v341_v2 }
 0x107   : > { %v582_v63 = vpop.eup %581 }
 0x108   : > { %v348_v1 = vrot.slane %v582_v63, %v916_v3  ;;  %v352_v7 = vld [vmem:[#allocation5] sm:$0xf] }
 0x10a   : > { %v350_v5 = vmul.f32 %v348_v1, %v343_v0 }
 0x10b   : > { %v584_v6 = vpop.eup %583 }
 0x10c   : > { %v351_v8 = vsub.f32 %v342_v4, %v350_v5  ;;  %v359_v10 = vrot.slane %v584_v6, %v916_v3 }
 0x10e   : > { %v353_v11 = vadd.f32 %v352_v7, %v351_v8  ;;  %v361_v12 = vmul.f32 %v359_v10, %v354_v9 }
 0x110   : > { %v362_v13 = vsub.f32 %v353_v11, %v361_v12 }
 0x112   : > { %v363_v14 = vsel %vm223_vm3, %v362_v13, 0.0 }
 0x113   : > { %364 = vadd.xlane.f32.xlu0 %v363_v14 }
 0x1a0   : > { %v365_v15 = vpop.xlane.xlu0 %364 }
 0x1a1   : > { %v366_v16 = vrot.slane %v365_v15, 4 }
 0x1a3   : > { %v367_v17 = vadd.f32 %v366_v16, %v365_v15 }
 0x1a5   : > { %v368_v18 = vrot.slane %v367_v17, 2 }
 0x1a7   : > { %v369_v19 = vadd.f32 %v368_v18, %v367_v17 }
 0x1a9   : > { %v370_v20 = vrot.slane %v369_v19, 1 }
 0x1ab   : > { %v371_v21 = vadd.f32 %v370_v20, %v369_v19 }
 0x1ad   : > { %511 = vpush %v371_v21 }
 0x1de   : > { %s512_s20 = spop %511 }
 0x1df   : > { %s373_s26 = smul.f32 0.25, %s512_s20 }
 0x1e1   : > { %v374_v3 = vstv %s373_s26 }
 0x1e2   : > { %375 = vst [vmem:[%s216_s21] sm:$0x1] %v374_v3 }
 0x1e3   : > { %658 = shalt.err (!%p655_p2)
}
 0x1e4   : > { %s659_s15 = scalar_lea.hbm %s946_s25, 16  ;;  %s663_s5 = scalar_lea.hbm %s997_s2, 32 }
 0x1e5   : > { %p660_p9 = scmp.ne.s32.totalorder %s946_s25, %s659_s15  ;;  %p664_p6 = scmp.lt.u32.totalorder %s946_s25, %s997_s2 }
 0x1e6   : > { %p665_p13 = scmp.lt.u32.totalorder %s663_s5, %s659_s15  ;;  %p667_p8 = scmp.lt.u32.totalorder %s659_s15, %s946_s25 }
 0x1e7   : > { %p661_p11 = pnand %p660_p9, %p1010_p0 }
 0x1e8   : > { %p666_p5 = por %p665_p13, %p664_p6 }
 0x1e9   : > { %p662_p3 = pneg %p661_p11 }
 0x1ea   : > { %p668_p7 = por %p667_p8, %p666_p5 }
 0x1ec   : > { %p669_p4 = pnand %p668_p7, %p662_p3 }
 0x1ee   : > { %672 = shalt.err (!%p669_p4)
}
 0x1ef   : > { %517 = dma.vmem_to_hbm [thread:$0]  (%p1010_p0), %s948_s19, 16, %s946_s25, %s377_s3  }
 0x1f0 PF: > { %s401_s21 = sand.u32 1, %s711_s9   ;;  %p1011_p10 = scmp.ne.s32.totalorder %s1003_s24, 0 }
 0x1f1   : > { %p1012_p12 = scmp.ge.s32.totalorder %s731_s14, 2  ;;  %s402_s30 = scalar_lea.sflag [#allocation10], %s401_s21 }
 0x1f3   : > { %p527_p1 = pnand %p1012_p12, %p1011_p10 }
 0x1f5   : > { %706 = dma.done.wait (!%p527_p1), %s402_s30, 16  }
 0x1f6   : > { %708 = vsyncadd (!%p527_p1), %s402_s30, 4294967280  ;;  %s21_s14 = sadd.s32 1, %s731_s14   ;;  %s1013_s9 = smov %s715_s10 }
 0x1f7   : > { %p18_p2 = scmp.ge.s32.totalorder %s21_s14, 4   ;;  %s1014_s10 = smov %s719_s11 }
 0x1f8   : > { %s1015_s11 = smov %s808_s23  ;;  %s1016_s12 = smov %s727_s13 }
 0x1f9   : > { %s1017_s13 = smov %s1019_s17  ;;  %20 = sbr.rel (!%p18_p2) target bundleno = 8 (0x8), region = 95 }
 0x200   :  { %406 = vsyncpa [#allocation9], 1 }
 0x201   :  { %408 = vsyncpa [#allocation9 + $0x1], 1 }
 0x202   :  { %409 = vsyncpa [#allocation12], 1 }
 0x203   :  { %411 = vsyncpa [#allocation12 + $0x1], 1 }
 0x204   :  { %412 = vsyncpa [#allocation10], 1 }
 0x205   :  { %414 = vsyncpa [#allocation10 + $0x1], 1 }

</bundles_post_ra>
